<compile_context>
chip_gen: v7x
topology: tpu7x:2x2x1
jax: 0.10.0
libtpu: 0.0.40
codegen_flags: <defaults>
</compile_context>

<pallas_src>
import jax
import jax.numpy as jnp
from jax.experimental import pallas as pl
from jax.experimental.pallas import tpu as pltpu

# norse LIFParameters() defaults
TAU_MEM_INV = 1.0 / 1e-2   # 100.0
V_LEAK = 0.0
V_TH = 1.0
V_RESET = 0.0

_LANES = 128


def _round_up(x: int, m: int) -> int:
    return ((x + m - 1) // m) * m


def _largest_divisor_leq(n: int, cap: int) -> int:
    """Largest divisor of n that is <= cap (>= 1)."""
    cap = max(1, min(cap, n))
    for d in range(cap, 0, -1):
        if n % d == 0:
            return d
    return 1


def _make_lif_kernel(tt: int, n_chunks: int, chunk_rows: int, alpha: float,
                     v_leak: float, v_th: float, v_reset: float):
    """Kernel processing `tt` timesteps of one (tile_r, 128) spatial tile."""
    beta = 1.0 - alpha

    def kernel(x_ref, z_ref, v_ref):
        tb = pl.program_id(1)          # time-block index (innermost grid axis)

        @pl.when(tb == 0)
        def _():
            v_ref[...] = jnp.zeros_like(v_ref)

        def process_chunk(r0):
            # Small row chunk: x/v live set stays within the vreg file.
            x = x_ref[pl.ds(r0, chunk_rows), :].astype(jnp.float32)
            c = alpha * (x + v_leak)                     # loop-invariant
            v = v_ref[pl.ds(r0, chunk_rows), :]
            # Fully unrolled timesteps; static `t` -> static store offsets.
            for t in range(tt):
                v = beta * v + c                         # 2 VALU ops / step
                spike = v > v_th
                z_ref[t, pl.ds(r0, chunk_rows), :] = spike.astype(z_ref.dtype)
                v = jnp.where(spike, v_reset, v)         # reset
            v_ref[pl.ds(r0, chunk_rows), :] = v          # one v store / chunk

        if n_chunks == 1:
            process_chunk(0)
        else:
            @pl.loop(0, n_chunks)
            def _(ci):
                process_chunk(pl.multiple_of(ci * chunk_rows, chunk_rows))

    return kernel


def constant_current_lif_encode(input_currents, seq_length: int, *,
                                dt: float = 0.001,
                                tau_mem_inv: float = TAU_MEM_INV,
                                v_leak: float = V_LEAK,
                                v_th: float = V_TH,
                                v_reset: float = V_RESET):
    """Pallas implementation. input_currents: any shape -> (T, *shape)."""
    orig_shape = input_currents.shape
    dtype = input_currents.dtype
    total = 1
    for d in orig_shape:
        total *= d

    itemsize = jnp.dtype(dtype).itemsize
    sub = 8 * max(1, 4 // itemsize)      # sublane multiple: 8 f32 / 16 bf16 / 32 i8

    # ---- spatial tiling: (r_pad, 128) rows split into n_spatial tiles -------
    R = pl.cdiv(total, _LANES)
    r_pad = _round_up(R, sub)            # minimal row padding only
    n_groups = r_pad // sub              # number of sublane groups
    max_c = max(1, 256 // sub)           # ~256 rows/tile target (<=4 MiB out blk)
    # Prefer >=2 spatial tiles so the "parallel" axis feeds both TensorCores
    # on v7x; costs at most one extra ~0.35us grid step per time block on
    # single-TC chips (v5e/v6e).
    cap_c = min(max_c, n_groups // 2) if n_groups >= 2 else 1
    c = _largest_divisor_leq(n_groups, cap_c)
    tile_r = sub * c
    n_spatial = n_groups // c

    # ---- in-kernel row chunking: keep live x/v to ~8 vregs each -------------
    max_chunk_c = max(1, 64 // sub)      # <= 64 rows per chunk
    chunk_c = _largest_divisor_leq(c, max_chunk_c)
    chunk_rows = sub * chunk_c
    n_chunks = tile_r // chunk_rows

    # ---- time blocking: tt divides seq_length -> no padding, no output copy -
    # TODO(synk): for large prime seq_length this degrades to tt=1; an
    # in-kernel tail mask would allow bigger tt without padding.
    tt = _largest_divisor_leq(seq_length, 32)
    n_tblocks = seq_length // tt

    # ---- lane-dense input slab ----------------------------------------------
    flat = input_currents.reshape(-1)
    pad = r_pad * _LANES - total
    if pad:
        flat = jnp.pad(flat, (0, pad))
    x2d = flat.reshape(r_pad, _LANES)

    alpha = float(dt) * float(tau_mem_inv)
    kernel = _make_lif_kernel(tt, n_chunks, chunk_rows, alpha,
                              float(v_leak), float(v_th), float(v_reset))

    out = pl.pallas_call(
        kernel,
        out_shape=jax.ShapeDtypeStruct((seq_length, r_pad, _LANES), dtype),
        grid_spec=pltpu.PrefetchScalarGridSpec(
            num_scalar_prefetch=0,
            grid=(n_spatial, n_tblocks),          # spatial outer, time inner
            in_specs=[
                pl.BlockSpec((tile_r, _LANES), lambda s, tb: (s, 0)),
            ],
            out_specs=pl.BlockSpec((tt, tile_r, _LANES),
                                   lambda s, tb: (tb, s, 0)),
            scratch_shapes=[pltpu.VMEM((tile_r, _LANES), jnp.float32)],
        ),
        compiler_params=pltpu.CompilerParams(
            dimension_semantics=("parallel", "arbitrary"),
        ),
    )(x2d)

    if r_pad * _LANES == total:
        # Fast path: pure reshape view, no extra HBM copy of the (T, N) output.
        return out.reshape((seq_length,) + orig_shape)
    # Ragged tail: the slice below forces one full-output copy (small inputs).
    out = out.reshape(seq_length, r_pad * _LANES)[:, :total]
    return out.reshape((seq_length,) + orig_shape)


class ConstantCurrentLIFEncoder:
    """Thin Python wrapper mirroring the torch.nn.Module interface."""

    def __init__(self, seq_length: int, dt: float = 0.001,
                 tau_mem_inv: float = TAU_MEM_INV, v_leak: float = V_LEAK,
                 v_th: float = V_TH, v_reset: float = V_RESET):
        self.seq_length = seq_length
        self.dt = dt
        self.tau_mem_inv = tau_mem_inv
        self.v_leak = v_leak
        self.v_th = v_th
        self.v_reset = v_reset

    def __call__(self, input_currents):
        return constant_current_lif_encode(
            input_currents, self.seq_length, dt=self.dt,
            tau_mem_inv=self.tau_mem_inv, v_leak=self.v_leak,
            v_th=self.v_th, v_reset=self.v_reset)


def _reference(input_currents, seq_length, dt=0.001,
               tau_mem_inv=TAU_MEM_INV, v_leak=V_LEAK, v_th=V_TH,
               v_reset=V_RESET):
    """Pure-JAX reference using the same recurrence order as the kernel.

    v = (1-a)*v + a*(x + v_leak) is algebraically identical to norse's
    v += dt*tau_mem_inv*((v_leak - v) + x); only the FP rounding order
    differs (matters only for measure-zero near-threshold inputs).
    Compute is f32, matching the kernel (norse computes in input dtype).
    """
    a = float(dt) * float(tau_mem_inv)
    b = 1.0 - a
    x = input_currents.astype(jnp.float32)
    cst = a * (x + v_leak)
    v = jnp.zeros_like(x)
    outs = []
    for _ in range(seq_length):
        v = b * v + cst
        spike = v > v_th
        outs.append(spike.astype(input_currents.dtype))
        v = jnp.where(spike, v_reset, v)
    return jnp.stack(outs, axis=0)


if __name__ == "__main__":
    key = jax.random.PRNGKey(0)
    B, C, H, W = 2, 4, 16, 16
    seq_length = 8

    # Positive-ish input currents so some neurons actually spike.
    x = jax.random.uniform(key, (B, C, H, W), dtype=jnp.float32,
                           minval=0.0, maxval=4.0)

    enc = ConstantCurrentLIFEncoder(seq_length=seq_length, dt=0.001)
    spikes = enc(x)
    spikes = jax.block_until_ready(spikes)

    assert spikes.shape == (seq_length, B, C, H, W), spikes.shape
    assert spikes.dtype == x.dtype, spikes.dtype

    ref = _reference(x, seq_length)
    if not bool(jnp.array_equal(spikes.astype(jnp.float32),
                                ref.astype(jnp.float32))):
        raise AssertionError("Pallas output does not match reference")

    print("KERNEL_OK")
</pallas_src>

<mosaic_0001>
module attributes {stable_mosaic.version = 11 : i64} {
  func.func @kernel(%arg0: i32, %arg1: i32, %arg2: memref<8x128xf32, #tpu.memory_space<vmem>>, %arg3: memref<8x8x128xf32, #tpu.memory_space<vmem>>, %arg4: memref<8x128xf32, #tpu.memory_space<vmem>>) attributes {dimension_semantics = [#tpu.dimension_semantics<parallel>, #tpu.dimension_semantics<arbitrary>], iteration_bounds = array<i64: 2, 1>, scalar_prefetch = 0 : i64, scratch_operands = 1 : i64, tpu.core_type = #tpu.core_type<tc>, window_params = [{transform_indices = @transform_0, window_bounds = array<i64: 8, 128>}, {transform_indices = @transform_1, window_bounds = array<i64: 8, 8, 128>}]} {
    %c0_i32 = arith.constant 0 : i32
    %0 = arith.cmpi eq, %arg1, %c0_i32 : i32
    %1 = arith.extui %0 : i1 to i32
    %c0_i32_0 = arith.constant 0 : i32
    %2 = arith.cmpi ne, %1, %c0_i32_0 : i32
    scf.if %2 {
      %cst_48 = arith.constant 0.000000e+00 : f32
      %106 = vector.broadcast %cst_48 : f32 to vector<8x128xf32>
      %c0_49 = arith.constant 0 : index
      %c0_50 = arith.constant 0 : index
      %107 = vector.load %arg4[%c0_49, %c0_50] : memref<8x128xf32, #tpu.memory_space<vmem>>, vector<8x128xf32>
      tpu.vector_store %arg4[%c0_49, %c0_50], %106 {strides = array<i32>} : memref<8x128xf32, #tpu.memory_space<vmem>>, vector<8x128xf32>,
    } else {
    }
    %c0 = arith.constant 0 : index
    %c0_1 = arith.constant 0 : index
    %3 = vector.load %arg2[%c0, %c0_1] : memref<8x128xf32, #tpu.memory_space<vmem>>, vector<8x128xf32>
    %cst = arith.constant 0.000000e+00 : f32
    %4 = vector.broadcast %cst : f32 to vector<8x128xf32>
    %5 = arith.addf %3, %4 : vector<8x128xf32>
    %cst_2 = arith.constant 1.000000e-01 : f32
    %6 = vector.broadcast %cst_2 : f32 to vector<8x128xf32>
    %7 = arith.mulf %6, %5 : vector<8x128xf32>
    %c0_3 = arith.constant 0 : index
    %c0_4 = arith.constant 0 : index
    %8 = vector.load %arg4[%c0_3, %c0_4] : memref<8x128xf32, #tpu.memory_space<vmem>>, vector<8x128xf32>
    %cst_5 = arith.constant 0.899999976 : f32
    %9 = vector.broadcast %cst_5 : f32 to vector<8x128xf32>
    %10 = arith.mulf %9, %8 : vector<8x128xf32>
    %11 = arith.addf %10, %7 : vector<8x128xf32>
    %cst_6 = arith.constant 1.000000e+00 : f32
    %12 = vector.broadcast %cst_6 : f32 to vector<8x128xf32>
    %13 = arith.cmpf ogt, %11, %12 : vector<8x128xf32>
    %14 = arith.extui %13 : vector<8x128xi1> to vector<8x128xi32>
    %15 = arith.sitofp %14 : vector<8x128xi32> to vector<8x128xf32>
    %c0_7 = arith.constant 0 : index
    %c0_8 = arith.constant 0 : index
    %c0_9 = arith.constant 0 : index
    %16 = vector.load %arg3[%c0_7, %c0_8, %c0_9] : memref<8x8x128xf32, #tpu.memory_space<vmem>>, vector<1x8x128xf32>
    %17 = vector.shape_cast %16 : vector<1x8x128xf32> to vector<8x128xf32>
    %18 = vector.shape_cast %15 : vector<8x128xf32> to vector<1x8x128xf32>
    tpu.vector_store %arg3[%c0_7, %c0_8, %c0_9], %18 {strides = array<i32>} : memref<8x8x128xf32, #tpu.memory_space<vmem>>, vector<1x8x128xf32>,
    %cst_10 = arith.constant 0.000000e+00 : f32
    %19 = vector.broadcast %cst_10 : f32 to vector<8x128xf32>
    %20 = arith.select %13, %19, %11 : vector<8x128xi1>, vector<8x128xf32>
    %cst_11 = arith.constant 0.899999976 : f32
    %21 = vector.broadcast %cst_11 : f32 to vector<8x128xf32>
    %22 = arith.mulf %21, %20 : vector<8x128xf32>
    %23 = arith.addf %22, %7 : vector<8x128xf32>
    %cst_12 = arith.constant 1.000000e+00 : f32
    %24 = vector.broadcast %cst_12 : f32 to vector<8x128xf32>
    %25 = arith.cmpf ogt, %23, %24 : vector<8x128xf32>
    %26 = arith.extui %25 : vector<8x128xi1> to vector<8x128xi32>
    %27 = arith.sitofp %26 : vector<8x128xi32> to vector<8x128xf32>
    %c1 = arith.constant 1 : index
    %c0_13 = arith.constant 0 : index
    %c0_14 = arith.constant 0 : index
    %28 = vector.load %arg3[%c1, %c0_13, %c0_14] : memref<8x8x128xf32, #tpu.memory_space<vmem>>, vector<1x8x128xf32>
    %29 = vector.shape_cast %28 : vector<1x8x128xf32> to vector<8x128xf32>
    %30 = vector.shape_cast %27 : vector<8x128xf32> to vector<1x8x128xf32>
    tpu.vector_store %arg3[%c1, %c0_13, %c0_14], %30 {strides = array<i32>} : memref<8x8x128xf32, #tpu.memory_space<vmem>>, vector<1x8x128xf32>,
    %cst_15 = arith.constant 0.000000e+00 : f32
    %31 = vector.broadcast %cst_15 : f32 to vector<8x128xf32>
    %32 = arith.select %25, %31, %23 : vector<8x128xi1>, vector<8x128xf32>
    %cst_16 = arith.constant 0.899999976 : f32
    %33 = vector.broadcast %cst_16 : f32 to vector<8x128xf32>
    %34 = arith.mulf %33, %32 : vector<8x128xf32>
    %35 = arith.addf %34, %7 : vector<8x128xf32>
    %cst_17 = arith.constant 1.000000e+00 : f32
    %36 = vector.broadcast %cst_17 : f32 to vector<8x128xf32>
    %37 = arith.cmpf ogt, %35, %36 : vector<8x128xf32>
    %38 = arith.extui %37 : vector<8x128xi1> to vector<8x128xi32>
    %39 = arith.sitofp %38 : vector<8x128xi32> to vector<8x128xf32>
    %c2 = arith.constant 2 : index
    %c0_18 = arith.constant 0 : index
    %c0_19 = arith.constant 0 : index
    %40 = vector.load %arg3[%c2, %c0_18, %c0_19] : memref<8x8x128xf32, #tpu.memory_space<vmem>>, vector<1x8x128xf32>
    %41 = vector.shape_cast %40 : vector<1x8x128xf32> to vector<8x128xf32>
    %42 = vector.shape_cast %39 : vector<8x128xf32> to vector<1x8x128xf32>
    tpu.vector_store %arg3[%c2, %c0_18, %c0_19], %42 {strides = array<i32>} : memref<8x8x128xf32, #tpu.memory_space<vmem>>, vector<1x8x128xf32>,
    %cst_20 = arith.constant 0.000000e+00 : f32
    %43 = vector.broadcast %cst_20 : f32 to vector<8x128xf32>
    %44 = arith.select %37, %43, %35 : vector<8x128xi1>, vector<8x128xf32>
    %cst_21 = arith.constant 0.899999976 : f32
    %45 = vector.broadcast %cst_21 : f32 to vector<8x128xf32>
    %46 = arith.mulf %45, %44 : vector<8x128xf32>
    %47 = arith.addf %46, %7 : vector<8x128xf32>
    %cst_22 = arith.constant 1.000000e+00 : f32
    %48 = vector.broadcast %cst_22 : f32 to vector<8x128xf32>
    %49 = arith.cmpf ogt, %47, %48 : vector<8x128xf32>
    %50 = arith.extui %49 : vector<8x128xi1> to vector<8x128xi32>
    %51 = arith.sitofp %50 : vector<8x128xi32> to vector<8x128xf32>
    %c3 = arith.constant 3 : index
    %c0_23 = arith.constant 0 : index
    %c0_24 = arith.constant 0 : index
    %52 = vector.load %arg3[%c3, %c0_23, %c0_24] : memref<8x8x128xf32, #tpu.memory_space<vmem>>, vector<1x8x128xf32>
    %53 = vector.shape_cast %52 : vector<1x8x128xf32> to vector<8x128xf32>
    %54 = vector.shape_cast %51 : vector<8x128xf32> to vector<1x8x128xf32>
    tpu.vector_store %arg3[%c3, %c0_23, %c0_24], %54 {strides = array<i32>} : memref<8x8x128xf32, #tpu.memory_space<vmem>>, vector<1x8x128xf32>,
    %cst_25 = arith.constant 0.000000e+00 : f32
    %55 = vector.broadcast %cst_25 : f32 to vector<8x128xf32>
    %56 = arith.select %49, %55, %47 : vector<8x128xi1>, vector<8x128xf32>
    %cst_26 = arith.constant 0.899999976 : f32
    %57 = vector.broadcast %cst_26 : f32 to vector<8x128xf32>
    %58 = arith.mulf %57, %56 : vector<8x128xf32>
    %59 = arith.addf %58, %7 : vector<8x128xf32>
    %cst_27 = arith.constant 1.000000e+00 : f32
    %60 = vector.broadcast %cst_27 : f32 to vector<8x128xf32>
    %61 = arith.cmpf ogt, %59, %60 : vector<8x128xf32>
    %62 = arith.extui %61 : vector<8x128xi1> to vector<8x128xi32>
    %63 = arith.sitofp %62 : vector<8x128xi32> to vector<8x128xf32>
    %c4 = arith.constant 4 : index
    %c0_28 = arith.constant 0 : index
    %c0_29 = arith.constant 0 : index
    %64 = vector.load %arg3[%c4, %c0_28, %c0_29] : memref<8x8x128xf32, #tpu.memory_space<vmem>>, vector<1x8x128xf32>
    %65 = vector.shape_cast %64 : vector<1x8x128xf32> to vector<8x128xf32>
    %66 = vector.shape_cast %63 : vector<8x128xf32> to vector<1x8x128xf32>
    tpu.vector_store %arg3[%c4, %c0_28, %c0_29], %66 {strides = array<i32>} : memref<8x8x128xf32, #tpu.memory_space<vmem>>, vector<1x8x128xf32>,
    %cst_30 = arith.constant 0.000000e+00 : f32
    %67 = vector.broadcast %cst_30 : f32 to vector<8x128xf32>
    %68 = arith.select %61, %67, %59 : vector<8x128xi1>, vector<8x128xf32>
    %cst_31 = arith.constant 0.899999976 : f32
    %69 = vector.broadcast %cst_31 : f32 to vector<8x128xf32>
    %70 = arith.mulf %69, %68 : vector<8x128xf32>
    %71 = arith.addf %70, %7 : vector<8x128xf32>
    %cst_32 = arith.constant 1.000000e+00 : f32
    %72 = vector.broadcast %cst_32 : f32 to vector<8x128xf32>
    %73 = arith.cmpf ogt, %71, %72 : vector<8x128xf32>
    %74 = arith.extui %73 : vector<8x128xi1> to vector<8x128xi32>
    %75 = arith.sitofp %74 : vector<8x128xi32> to vector<8x128xf32>
    %c5 = arith.constant 5 : index
    %c0_33 = arith.constant 0 : index
    %c0_34 = arith.constant 0 : index
    %76 = vector.load %arg3[%c5, %c0_33, %c0_34] : memref<8x8x128xf32, #tpu.memory_space<vmem>>, vector<1x8x128xf32>
    %77 = vector.shape_cast %76 : vector<1x8x128xf32> to vector<8x128xf32>
    %78 = vector.shape_cast %75 : vector<8x128xf32> to vector<1x8x128xf32>
    tpu.vector_store %arg3[%c5, %c0_33, %c0_34], %78 {strides = array<i32>} : memref<8x8x128xf32, #tpu.memory_space<vmem>>, vector<1x8x128xf32>,
    %cst_35 = arith.constant 0.000000e+00 : f32
    %79 = vector.broadcast %cst_35 : f32 to vector<8x128xf32>
    %80 = arith.select %73, %79, %71 : vector<8x128xi1>, vector<8x128xf32>
    %cst_36 = arith.constant 0.899999976 : f32
    %81 = vector.broadcast %cst_36 : f32 to vector<8x128xf32>
    %82 = arith.mulf %81, %80 : vector<8x128xf32>
    %83 = arith.addf %82, %7 : vector<8x128xf32>
    %cst_37 = arith.constant 1.000000e+00 : f32
    %84 = vector.broadcast %cst_37 : f32 to vector<8x128xf32>
    %85 = arith.cmpf ogt, %83, %84 : vector<8x128xf32>
    %86 = arith.extui %85 : vector<8x128xi1> to vector<8x128xi32>
    %87 = arith.sitofp %86 : vector<8x128xi32> to vector<8x128xf32>
    %c6 = arith.constant 6 : index
    %c0_38 = arith.constant 0 : index
    %c0_39 = arith.constant 0 : index
    %88 = vector.load %arg3[%c6, %c0_38, %c0_39] : memref<8x8x128xf32, #tpu.memory_space<vmem>>, vector<1x8x128xf32>
    %89 = vector.shape_cast %88 : vector<1x8x128xf32> to vector<8x128xf32>
    %90 = vector.shape_cast %87 : vector<8x128xf32> to vector<1x8x128xf32>
    tpu.vector_store %arg3[%c6, %c0_38, %c0_39], %90 {strides = array<i32>} : memref<8x8x128xf32, #tpu.memory_space<vmem>>, vector<1x8x128xf32>,
    %cst_40 = arith.constant 0.000000e+00 : f32
    %91 = vector.broadcast %cst_40 : f32 to vector<8x128xf32>
    %92 = arith.select %85, %91, %83 : vector<8x128xi1>, vector<8x128xf32>
    %cst_41 = arith.constant 0.899999976 : f32
    %93 = vector.broadcast %cst_41 : f32 to vector<8x128xf32>
    %94 = arith.mulf %93, %92 : vector<8x128xf32>
    %95 = arith.addf %94, %7 : vector<8x128xf32>
    %cst_42 = arith.constant 1.000000e+00 : f32
    %96 = vector.broadcast %cst_42 : f32 to vector<8x128xf32>
    %97 = arith.cmpf ogt, %95, %96 : vector<8x128xf32>
    %98 = arith.extui %97 : vector<8x128xi1> to vector<8x128xi32>
    %99 = arith.sitofp %98 : vector<8x128xi32> to vector<8x128xf32>
    %c7 = arith.constant 7 : index
    %c0_43 = arith.constant 0 : index
    %c0_44 = arith.constant 0 : index
    %100 = vector.load %arg3[%c7, %c0_43, %c0_44] : memref<8x8x128xf32, #tpu.memory_space<vmem>>, vector<1x8x128xf32>
    %101 = vector.shape_cast %100 : vector<1x8x128xf32> to vector<8x128xf32>
    %102 = vector.shape_cast %99 : vector<8x128xf32> to vector<1x8x128xf32>
    tpu.vector_store %arg3[%c7, %c0_43, %c0_44], %102 {strides = array<i32>} : memref<8x8x128xf32, #tpu.memory_space<vmem>>, vector<1x8x128xf32>,
    %cst_45 = arith.constant 0.000000e+00 : f32
    %103 = vector.broadcast %cst_45 : f32 to vector<8x128xf32>
    %104 = arith.select %97, %103, %95 : vector<8x128xi1>, vector<8x128xf32>
    %c0_46 = arith.constant 0 : index
    %c0_47 = arith.constant 0 : index
    %105 = vector.load %arg4[%c0_46, %c0_47] : memref<8x128xf32, #tpu.memory_space<vmem>>, vector<8x128xf32>
    tpu.vector_store %arg4[%c0_46, %c0_47], %104 {strides = array<i32>} : memref<8x128xf32, #tpu.memory_space<vmem>>, vector<8x128xf32>,
    return
  }
  func.func @transform_0(%arg0: i32, %arg1: i32) -> (i32, i32) {
    %c0_i32 = arith.constant 0 : i32
    %c0_i32_0 = arith.constant 0 : i32
    return %arg0, %c0_i32 : i32, i32
  }
  func.func @transform_1(%arg0: i32, %arg1: i32) -> (i32, i32, i32) {
    %c0_i32 = arith.constant 0 : i32
    %c0_i32_0 = arith.constant 0 : i32
    return %arg1, %arg0, %c0_i32 : i32, i32, i32
  }
}

</mosaic_0001>

<bundles_post_ra>
// kernel: tpu_custom_call.1
= control target key start
LH: loop header
LB: loop body
LE: loop exit
PB: predicated region body
PF: predicated region fallthrough
CT: control target
= control target key end

     0   :  { %6 = vsyncpa [#allocation4], 0  ;;  %s729_s0 = inlined_call_operand.hbm [shape: f32[16,128], index: 0, kind: input, shape index: {}]   ;;  %s730_s1 = inlined_call_operand.hbm [shape: f32[8,16,128], index: 1, kind: output, shape index: {}]  }
   0x1   :  { %8 = vsyncpa [#allocation4 + $0x1], 0 }
   0x2   :  { %9 = vsyncpa [#allocation5], 0 }
   0x3   :  { %11 = vsyncpa [#allocation5 + $0x1], 0  ;;  %s543_s6 = smov 0   ;;  %s545_s7 = smov 0  }
   0x4   :  { %s547_s8 = smov 0   ;;  %s549_s9 = smov 0  }
   0x5   :  { %s551_s10 = smov 0   ;;  %s553_s11 = smov 0  }
   0x6 LB: > { %s319_s12 = sadd.s32 4294967295, %s525_s11   ;;  %s320_s13 = sadd.s32 4294967294, %s525_s11   ;;  %s525_s11 = sphi %s553_s11, %s17_s11   ;;  %s521_s10 = sphi %s551_s10, %s746_s10   ;;  %s517_s9 = sphi %s549_s9, %s745_s9   ;;  %s513_s8 = sphi %s547_s8, %s744_s8   ;;  %s509_s7 = sphi %s545_s7, %s743_s7   ;;  %s505_s6 = sphi %s543_s6, %s742_s6  }
   0x7   : > { %s29_s14 = sadd.s32 1, %s521_s10  ;;  %s36_s15 = sadd.s32 1, %s513_s8 }
   0x8   : > { %p31_p0 = scmp.ge.s32.totalorder %s29_s14, 2  ;;  %p43_p1 = scmp.ne.s32.totalorder %s513_s8, %s509_s7 }
   0x9   : > { %p44_p2 = scmp.eq.s32.totalorder %s525_s11, 0  ;;  %p49_p3 = scmp.ne.s32.totalorder %s509_s7, %s505_s6 }
   0xa   : > { %s748_s14 = smov (%p31_p0, %s29_s14), 0  ;;  %p50_p5 = scmp.eq.s32.totalorder %s319_s12, 0 }
   0xb   : > { %p584_p4 = por %p44_p2, %p43_p1  ;;  %s33_s17 = ssub.s32 %s521_s10, %s748_s14 }
   0xc   : > { %p75_p6 = scmp.eq.s32.totalorder %s319_s12, 1  ;;  %p34_p7 = scmp.eq.s32.totalorder %s33_s17, 0 }
   0xd   : > { %p590_p8 = por %p50_p5, %p49_p3  ;;  %p81_p10 = scmp.eq.s32.totalorder %s320_s13, 1 }
   0xe   : > { %p594_p9 = por %p75_p6, %p43_p1  ;;  %p359_p13 = scmp.lt.s32.totalorder %s525_s11, 2 }
   0xf   : > { %s599_s20 = scalar_select %p34_p7, %s513_s8, %s36_s15  }
  0x10   : > { %s734_s19 = scalar_select %p594_p9, 1, 0 }
  0x11   : > { %p601_p11 = por %p81_p10, %p49_p3  ;;  %s101_s22 = sand.u32 1, %s513_s8  }
  0x12   : > { %s323_s23 = sshll.u32 %s101_s22, 3  ;;  %s324_s24 = sshll.u32 %s521_s10, 7 }
  0x13   : > { %s735_s21 = scalar_select %p601_p11, 1, 0 }
  0x14   : > { %s612_s27 = scalar_lea.hbm %s729_s0, %s324_s24  ;;  %s105_s28 = scalar_lea.vmem [#allocation3], %s323_s23 }
  0x15   : > { %s112_s29 = sshll.u32 %s105_s28, 4  ;;  %p618_p0 = pnand %p359_p13, %p584_p4  ;;  %s614_s29 = int_to_ptr.vmem [resolvable:$true] %s112_s29 }
  0x16   : > { %s102_s2 = scalar_lea.sflag [#allocation4], %s101_s22  ;;  %s413_s3 = scalar_lea.hbm %s612_s27, 128 }
  0x17   : > { %p414_p3 = scmp.ne.s32.totalorder %s612_s27, %s413_s3  ;;  %p415_p5 = pneg %p618_p0 }
  0x18   : > { %s418_s12 = scalar_lea.hbm %s729_s0, 256  ;;  %p419_p4 = scmp.lt.u32.totalorder %s612_s27, %s729_s0 }
  0x19   : > { %p416_p6 = pnand %p415_p5, %p414_p3  ;;  %p420_p10 = scmp.lt.u32.totalorder %s418_s12, %s413_s3 }
  0x1a   : > { %p422_p12 = scmp.lt.u32.totalorder %s413_s3, %s612_s27 }
  0x1b   : > { %p417_p7 = pneg %p416_p6  ;;  %p421_p13 = por %p420_p10, %p419_p4 }
  0x1d   : > { %p423_p1 = por %p422_p12, %p421_p13 }
  0x1f   : > { %p424_p2 = pnand %p423_p1, %p417_p7 }
  0x21   : > { %427 = shalt.err (!%p424_p2)
}
  0x22   : > { %s428_s16 = scalar_lea.vmem %s614_s29, 128  ;;  %s527_s17 = smov [#allocation3]  }
  0x23   : > { %p429_p3 = scmp.ne.s32.totalorder %s614_s29, %s428_s16  ;;  %s433_s22 = sshll.u32 %s527_s17, 4  ;;  %s434_s22 = int_to_ptr.vmem [resolvable:$false] %s433_s22 }
  0x24   : > { %s435_s23 = scalar_lea.vmem %s434_s22, 256  ;;  %p436_p9 = scmp.lt.s32.totalorder %s614_s29, %s434_s22 }
  0x25   : > { %p431_p6 = pnand %p429_p3, %p415_p5  ;;  %p437_p4 = scmp.lt.s32.totalorder %s435_s23, %s428_s16 }
  0x27   : > { %p432_p11 = pneg %p431_p6  ;;  %p438_p10 = por %p437_p4, %p436_p9 }
  0x29   : > { %p439_p12 = pnand %p438_p10, %p432_p11 }
  0x2b   : > { %442 = shalt.err (!%p439_p12)
}
  0x2c   : > { %354 = dma.hbm_to_vmem [thread:$0]  (!%p618_p0), %s612_s27, 128, %s614_s29, %s102_s2  }
  0x2d   : > { %p737_p1 = scmp.lt.s32.totalorder %s525_s11, 3  ;;  %p738_p2 = scmp.ge.s32.totalorder %s525_s11, 1 }
  0x2f   : > { %p118_p5 = pnand %p738_p2, %p737_p1 }
  0x30   : > { %s654_s24 = sand.u32 (!%p118_p5), 1, %s509_s7  }
  0x31   : > { %121 = sbr.rel (%p118_p5) target bundleno = 120 (0x78), region = 24  ;;  %s326_s25 = sshll.u32 (!%p118_p5), %s654_s24, 3 }
  0x32   : > { %s124_s26 = scalar_lea.sflag (!%p118_p5), [#allocation4], %s654_s24  ;;  %s127_s28 = scalar_lea.vmem (!%p118_p5), [#allocation3], %s326_s25 }
  0x38   : > { %496 = dma.done.wait (%p590_p8), %s124_s26, 128  }
  0x39   : > { %498 = vsyncadd (%p590_p8), %s124_s26, 4294967168  ;;  %s327_s27 = sshll.u32 %s654_s24, 6  ;;  %v152_v0 = vld [vmem:[%s127_s28] sm:$0xff]  ;;  %v528_v2 = vmov 0.0   ;;  %s344_s18 = sshll.u32 %s517_s9, 7 }
  0x3a   : > { %v154_v1 = vmul.f32 0.1, %v152_v0  ;;  %s663_s29 = scalar_lea.vmem [#allocation6], %s327_s27  ;;  %s677_s4 = scalar_lea.hbm %s730_s1, %s344_s18 }
  0x3b   : > { %s236_s30 = sshll.u32 %s663_s29, 4  ;;  %s221_s5 = scalar_lea.sflag [#allocation5], %s654_s24  ;;  %s679_s30 = int_to_ptr.vmem [resolvable:$true] %s236_s30 }
  0x3c   : > { %vm158_vm0 = vcmp.gt.f32.partialorder %v154_v1, 1.0  ;;  %s443_s12 = scalar_lea.vmem %s679_s30, 1024  ;;  %p739_p9 = scmp.ne.s32.totalorder %s734_s19, 0 }
  0x3d   : > { %v328_v3 = vsel %vm158_vm0, 1.0, %v528_v2  ;;  %v162_v4 = vsel %vm158_vm0, 0.0, %v154_v1  ;;  %p444_p8 = scmp.ne.s32.totalorder %s679_s30, %s443_s12  ;;  %s529_s9 = smov [#allocation6]  }
  0x3e   : > { %161 = vst [vmem:[%s663_s29] sm:$0xff] %v328_v3  ;;  %v163_v5 = vmul.f32 0.9, %v162_v4  ;;  %s447_s13 = sshll.u32 %s529_s9, 4  ;;  %s448_s13 = int_to_ptr.vmem [resolvable:$false] %s447_s13 }
  0x3f   : > { %p445_p11 = pnand %p444_p8, %p739_p9  ;;  %s449_s15 = scalar_lea.vmem %s448_s13, 2048 }
  0x40   : > { %v164_v6 = vadd.f32 %v163_v5, %v154_v1  ;;  %p450_p7 = scmp.lt.s32.totalorder %s679_s30, %s448_s13  ;;  %p451_p13 = scmp.lt.s32.totalorder %s449_s15, %s443_s12 }
  0x41   : > { %p446_p0 = pneg %p445_p11 }
  0x42   : > { %vm165_vm1 = vcmp.gt.f32.partialorder %v164_v6, 1.0  ;;  %p452_p3 = por %p451_p13, %p450_p7 }
  0x43   : > { %v329_v7 = vsel %vm165_vm1, 1.0, %v528_v2  ;;  %v170_v8 = vsel %vm165_vm1, 0.0, %v164_v6 }
  0x44   : > { %330 = vst [vmem:[%s663_s29 + $0x8] sm:$0xff] %v329_v7  ;;  %v171_v9 = vmul.f32 0.9, %v170_v8  ;;  %p453_p6 = pnand %p452_p3, %p446_p0 }
  0x46   : > { %v172_v10 = vadd.f32 %v171_v9, %v154_v1 }
  0x48   : > { %vm173_vm2 = vcmp.gt.f32.partialorder %v172_v10, 1.0 }
  0x49   : > { %v331_v11 = vsel %vm173_vm2, 1.0, %v528_v2  ;;  %v178_v12 = vsel %vm173_vm2, 0.0, %v172_v10 }
  0x4a   : > { %332 = vst [vmem:[%s663_s29 + $0x10] sm:$0xff] %v331_v11  ;;  %v179_v13 = vmul.f32 0.9, %v178_v12 }
  0x4c   : > { %v180_v14 = vadd.f32 %v179_v13, %v154_v1 }
  0x4e   : > { %vm181_vm3 = vcmp.gt.f32.partialorder %v180_v14, 1.0 }
  0x4f   : > { %v333_v15 = vsel %vm181_vm3, 1.0, %v528_v2  ;;  %v186_v16 = vsel %vm181_vm3, 0.0, %v180_v14 }
  0x50   : > { %334 = vst [vmem:[%s663_s29 + $0x18] sm:$0xff] %v333_v15  ;;  %v187_v17 = vmul.f32 0.9, %v186_v16 }
  0x52   : > { %v188_v18 = vadd.f32 %v187_v17, %v154_v1 }
  0x54   : > { %vm189_vm4 = vcmp.gt.f32.partialorder %v188_v18, 1.0 }
  0x55   : > { %v335_v19 = vsel %vm189_vm4, 1.0, %v528_v2  ;;  %v194_v20 = vsel %vm189_vm4, 0.0, %v188_v18 }
  0x56   : > { %336 = vst [vmem:[%s663_s29 + $0x20] sm:$0xff] %v335_v19  ;;  %v195_v21 = vmul.f32 0.9, %v194_v20 }
  0x58   : > { %v196_v22 = vadd.f32 %v195_v21, %v154_v1 }
  0x5a   : > { %vm197_vm5 = vcmp.gt.f32.partialorder %v196_v22, 1.0 }
  0x5b   : > { %v337_v23 = vsel %vm197_vm5, 1.0, %v528_v2  ;;  %v202_v24 = vsel %vm197_vm5, 0.0, %v196_v22 }
  0x5c   : > { %338 = vst [vmem:[%s663_s29 + $0x28] sm:$0xff] %v337_v23  ;;  %v203_v25 = vmul.f32 0.9, %v202_v24 }
  0x5e   : > { %v204_v26 = vadd.f32 %v203_v25, %v154_v1 }
  0x60   : > { %vm205_vm6 = vcmp.gt.f32.partialorder %v204_v26, 1.0 }
  0x61   : > { %v339_v27 = vsel %vm205_vm6, 1.0, %v528_v2  ;;  %v210_v28 = vsel %vm205_vm6, 0.0, %v204_v26 }
  0x62   : > { %340 = vst [vmem:[%s663_s29 + $0x30] sm:$0xff] %v339_v27  ;;  %v211_v29 = vmul.f32 0.9, %v210_v28 }
  0x64   : > { %v212_v30 = vadd.f32 %v211_v29, %v154_v1 }
  0x66   : > { %vm213_vm7 = vcmp.gt.f32.partialorder %v212_v30, 1.0 }
  0x67   : > { %v341_v31 = vsel %vm213_vm7, 1.0, %v528_v2 }
  0x68   : > { %342 = vst [vmem:[%s663_s29 + $0x38] sm:$0xff] %v341_v31 }
  0x69   : > { %456 = shalt.err (!%p453_p6)
}
  0x6a   : > { %s457_s16 = scalar_lea.hbm %s677_s4, 1024  ;;  %s461_s23 = scalar_lea.hbm %s730_s1, 2048 }
  0x6b   : > { %p458_p4 = scmp.ne.s32.totalorder %s677_s4, %s457_s16  ;;  %p462_p1 = scmp.lt.u32.totalorder %s677_s4, %s730_s1 }
  0x6c   : > { %p463_p2 = scmp.lt.u32.totalorder %s461_s23, %s457_s16  ;;  %p465_p8 = scmp.lt.u32.totalorder %s457_s16, %s677_s4 }
  0x6d   : > { %p459_p10 = pnand %p458_p4, %p739_p9 }
  0x6e   : > { %p464_p5 = por %p463_p2, %p462_p1 }
  0x6f   : > { %p460_p12 = pneg %p459_p10 }
  0x70   : > { %p466_p11 = por %p465_p8, %p464_p5 }
  0x72   : > { %p467_p0 = pnand %p466_p11, %p460_p12 }
  0x74   : > { %470 = shalt.err (!%p467_p0)
}
  0x75   : > { %s530_s28 = smov 128   ;;  %s531_s27 = smov 256  }
  0x76   : > { %s532_s29 = smov 8  }
  0x77   : > { %349 = dma.vmem_to_hbm [thread:$0]  (%p739_p9), %s679_s30, 1024, %s677_s4, %s221_s5, %s530_s28, %s531_s27, %s532_s29  }
  0x78 PF: > { %s251_s18 = sand.u32 1, %s505_s6   ;;  %p740_p7 = scmp.ne.s32.totalorder %s735_s21, 0 }
  0x79   : > { %p741_p13 = scmp.ge.s32.totalorder %s525_s11, 2  ;;  %s252_s2 = scalar_lea.sflag [#allocation5], %s251_s18 }
  0x7b   : > { %p356_p3 = pnand %p741_p13, %p740_p7 }
  0x7d   : > { %500 = dma.done.wait (!%p356_p3), %s252_s2, 1024  }
  0x7e   : > { %502 = vsyncadd (!%p356_p3), %s252_s2, 4294966272  ;;  %s17_s11 = sadd.s32 1, %s525_s11   ;;  %s742_s6 = smov %s509_s7 }
  0x7f   : > { %p14_p6 = scmp.ge.s32.totalorder %s17_s11, 4   ;;  %s743_s7 = smov %s513_s8 }
  0x80   : > { %s744_s8 = smov %s599_s20  ;;  %s745_s9 = smov %s521_s10 }
  0x81   : > { %s746_s10 = smov %s748_s14  ;;  %16 = sbr.rel (!%p14_p6) target bundleno = 6 (0x6), region = 80 }
  0x88   :  { %257 = vsyncpa [#allocation4], 1 }
  0x89   :  { %259 = vsyncpa [#allocation4 + $0x1], 1 }
  0x8a   :  { %260 = vsyncpa [#allocation5], 1 }
  0x8b   :  { %262 = vsyncpa [#allocation5 + $0x1], 1 }

</bundles_post_ra>
